<compile_context>
chip_gen: v6e
topology: v6e:2x2x1
jax: 0.10.0
libtpu: 0.0.40
codegen_flags: <defaults>
</compile_context>

<pallas_src>
import jax
import jax.numpy as jnp
from jax.experimental import pallas as pl
from jax.experimental.pallas import tpu as pltpu


# ----------------------------------------------------------------------------
# Fused TemporalBlock kernel
# ----------------------------------------------------------------------------
def _make_temporal_block_kernel(K, dilation, tile_l, has_downsample, use_prev):
    """Fused: relu(conv2(relu(conv1(x))) + residual), causal dilated convs."""
    pad = (K - 1) * dilation          # causal left pad of each conv
    halo = 2 * pad                    # x history needed so conv2 sees conv1 halo
    lh = tile_l + pad                 # conv1 output columns: positions [start-pad, end)

    def kernel(*refs):
        i = 0
        xc_ref = refs[i]; i += 1                       # (1, Cin, TL) current tile
        xp_ref = None
        if use_prev:
            xp_ref = refs[i]; i += 1                   # (1, Cin, TL) previous tile
        w1_ref, b1_ref, w2_ref, b2_ref = refs[i:i + 4]; i += 4
        if has_downsample:
            wd_ref, bd_ref = refs[i:i + 2]; i += 2
        o_ref = refs[i]                                # (1, Cout, TL)

        j = pl.program_id(1)
        x_cur = xc_ref[0].astype(jnp.float32)          # (Cin, TL)

        # Assemble causal input window: `halo` columns of history + current tile.
        if halo > 0:
            if use_prev:
                tail = xp_ref[0, :, tile_l - halo:].astype(jnp.float32)
                tail = tail * (j > 0).astype(jnp.float32)   # first tile: history is zeros
            else:
                tail = jnp.zeros((x_cur.shape[0], halo), jnp.float32)
            xw = jnp.concatenate([tail, x_cur], axis=1)     # (Cin, TL + 2*pad)
        else:
            xw = x_cur

        # conv1 + bias + ReLU — single MXU matmul over the K*Cin contraction.
        xcols1 = jnp.concatenate(
            [xw[:, t * dilation: t * dilation + lh] for t in range(K)], axis=0)
        h = jnp.dot(w1_ref[...], xcols1, preferred_element_type=jnp.float32)
        h = jnp.maximum(h + b1_ref[...], 0.0)               # (Cout, TL + pad)
        if pad > 0:
            # h columns at sequence positions < 0 correspond to conv2's causal
            # zero padding (NOT conv1 applied to zero input) -> force to zero.
            col = jax.lax.broadcasted_iota(jnp.int32, (1, lh), 1)
            h = jnp.where(j * tile_l - pad + col >= 0, h, 0.0)

        # conv2 + bias + ReLU — single matmul over the K*Cout contraction.
        xcols2 = jnp.concatenate(
            [h[:, t * dilation: t * dilation + tile_l] for t in range(K)], axis=0)
        o = jnp.dot(w2_ref[...], xcols2, preferred_element_type=jnp.float32)
        o = jnp.maximum(o + b2_ref[...], 0.0)               # (Cout, TL)

        # Residual path (identity or fused 1x1 downsample) + final ReLU.
        if has_downsample:
            res = jnp.dot(wd_ref[...], x_cur,
                          preferred_element_type=jnp.float32) + bd_ref[...]
        else:
            res = x_cur
        o_ref[0] = jnp.maximum(o + res, 0.0).astype(o_ref.dtype)

    return kernel


def _choose_tile_l(L, halo, max_tile=1024):
    """Biggest lane-dense tile (multiple of 128) that divides L and covers the halo."""
    t = max_tile
    while t >= 128:
        if L % t == 0 and t >= halo:
            return t
        t //= 2
    # TODO(synk): for L not divisible by a 128-multiple, pad L at the model boundary.
    return L


# ----------------------------------------------------------------------------
# pallas_call wrapper: one fused call per TemporalBlock
# ----------------------------------------------------------------------------
def temporal_block_forward(x, p, dilation, tile_l=None):
    B, Cin, L = x.shape
    Cout, _, K = p["v1"].shape
    pad = (K - 1) * dilation
    halo = 2 * pad

    # weight_norm reparameterisation (dim=0, as in torch): w = g * v / ||v||.
    w1 = _weight_norm(p["v1"], p["g1"])                              # (Cout, Cin, K)
    w2 = _weight_norm(p["v2"], p["g2"])                              # (Cout, Cout, K)
    # Flatten taps into the contraction axis: W[o, t*C + c] = w[o, c, t].
    w1f = jnp.transpose(w1, (0, 2, 1)).reshape(Cout, K * Cin)
    w2f = jnp.transpose(w2, (0, 2, 1)).reshape(Cout, K * Cout)
    b1 = p["b1"].reshape(Cout, 1)
    b2 = p["b2"].reshape(Cout, 1)
    has_down = "wd" in p

    TL = _choose_tile_l(L, halo) if tile_l is None else tile_l
    assert L % TL == 0, "sequence length must be divisible by the L tile"
    nL = L // TL
    use_prev = nL > 1
    if use_prev:
        assert TL >= halo, "L tile must cover the causal halo"

    kern = _make_temporal_block_kernel(K, dilation, TL, has_down, use_prev)

    in_specs = [pl.BlockSpec((1, Cin, TL), lambda b, j: (b, 0, j))]
    inputs = [x]
    if use_prev:
        # Previous L tile supplies the causal halo (masked to zero for j == 0).
        in_specs.append(
            pl.BlockSpec((1, Cin, TL), lambda b, j: (b, 0, jnp.maximum(j - 1, 0))))
        inputs.append(x)
    in_specs += [
        pl.BlockSpec((Cout, K * Cin), lambda b, j: (0, 0)),
        pl.BlockSpec((Cout, 1), lambda b, j: (0, 0)),
        pl.BlockSpec((Cout, K * Cout), lambda b, j: (0, 0)),
        pl.BlockSpec((Cout, 1), lambda b, j: (0, 0)),
    ]
    inputs += [w1f, b1, w2f, b2]
    if has_down:
        in_specs += [pl.BlockSpec((Cout, Cin), lambda b, j: (0, 0)),
                     pl.BlockSpec((Cout, 1), lambda b, j: (0, 0))]
        inputs += [p["wd"][:, :, 0], p["bd"].reshape(Cout, 1)]

    return pl.pallas_call(
        kern,
        out_shape=jax.ShapeDtypeStruct((B, Cout, L), x.dtype),
        grid=(B, nL),
        in_specs=in_specs,
        out_specs=pl.BlockSpec((1, Cout, TL), lambda b, j: (b, 0, j)),
        compiler_params=pltpu.CompilerParams(
            dimension_semantics=("parallel", "parallel"),
            vmem_limit_bytes=64 * 1024 * 1024),
    )(*inputs)


def tcn_forward(x, params, tile_l=None):
    out = x
    for i, p in enumerate(params):
        out = temporal_block_forward(out, p, dilation=2 ** i, tile_l=tile_l)
    return out


# ----------------------------------------------------------------------------
# Parameter construction (deterministic, in-script)
# ----------------------------------------------------------------------------
def _weight_norm(v, g):
    # per-output-channel L2 norm over (in_channels, kernel), as torch weight_norm(dim=0)
    norm = jnp.sqrt(jnp.sum(v * v, axis=(1, 2), keepdims=True))
    return g[:, None, None] * v / norm


def init_block_params(key, cin, cout, K):
    ks = jax.random.split(key, 8)
    p = {}
    p["v1"] = 0.1 * jax.random.normal(ks[0], (cout, cin, K), jnp.float32)
    p["g1"] = 1.0 + 0.1 * jax.random.normal(ks[1], (cout,), jnp.float32)
    p["b1"] = 0.1 * jax.random.normal(ks[2], (cout,), jnp.float32)
    p["v2"] = 0.1 * jax.random.normal(ks[3], (cout, cout, K), jnp.float32)
    p["g2"] = 1.0 + 0.1 * jax.random.normal(ks[4], (cout,), jnp.float32)
    p["b2"] = 0.1 * jax.random.normal(ks[5], (cout,), jnp.float32)
    if cin != cout:
        p["wd"] = 0.1 * jax.random.normal(ks[6], (cout, cin, 1), jnp.float32)
        p["bd"] = 0.1 * jax.random.normal(ks[7], (cout,), jnp.float32)
    return p


def init_tcn_params(key, num_inputs, num_channels, kernel_size):
    params = []
    keys = jax.random.split(key, len(num_channels))
    for i, cout in enumerate(num_channels):
        cin = num_inputs if i == 0 else num_channels[i - 1]
        params.append(init_block_params(keys[i], cin, cout, kernel_size))
    return params


# ----------------------------------------------------------------------------
# Pure-JAX reference (for correctness check)
# ----------------------------------------------------------------------------
def _ref_conv(x, w, b, dilation):
    B, Cin, L = x.shape
    Cout, _, K = w.shape
    pad = (K - 1) * dilation
    xp = jnp.pad(x, ((0, 0), (0, 0), (pad, 0)))
    out = jnp.zeros((B, Cout, L), jnp.float32)
    for t in range(K):
        out = out + jnp.einsum(
            "oi,bil->bol", w[:, :, t], xp[:, :, t * dilation: t * dilation + L])
    return out + b[None, :, None]


def _ref_block(x, p, dilation):
    w1 = _weight_norm(p["v1"], p["g1"])
    w2 = _weight_norm(p["v2"], p["g2"])
    out = jax.nn.relu(_ref_conv(x, w1, p["b1"], dilation))
    out = jax.nn.relu(_ref_conv(out, w2, p["b2"], dilation))
    res = _ref_conv(x, p["wd"], p["bd"], 1) if "wd" in p else x
    return jax.nn.relu(out + res)


def _ref_tcn(x, params):
    out = x
    for i, p in enumerate(params):
        out = _ref_block(out, p, dilation=2 ** i)
    return out


# ----------------------------------------------------------------------------
if __name__ == "__main__":
    key = jax.random.PRNGKey(0)
    k_x, k_p, k_x2, k_p2 = jax.random.split(key, 4)

    # Test 1: the spec's toy shapes (single L tile, with & without downsample).
    B, num_inputs, L = 2, 4, 16
    num_channels = [8, 8]          # 2 TemporalBlocks, dilations 1 and 2
    kernel_size = 2
    x = jax.random.normal(k_x, (B, num_inputs, L), jnp.float32)
    params = init_tcn_params(k_p, num_inputs, num_channels, kernel_size)
    out = jax.block_until_ready(tcn_forward(x, params))
    ref = _ref_tcn(x, params)
    assert out.shape == (B, num_channels[-1], L)
    assert jnp.allclose(out, ref, atol=1e-4, rtol=1e-4), "mismatch vs reference (toy)"

    # Test 2: lane-dense multi-tile path (TL=128, 2 tiles, K=3, halo from prev tile).
    B2, C2, L2 = 2, 8, 256
    x2 = jax.random.normal(k_x2, (B2, C2, L2), jnp.float32)
    params2 = init_tcn_params(k_p2, C2, [16, 16], 3)
    out2 = jax.block_until_ready(tcn_forward(x2, params2, tile_l=128))
    ref2 = _ref_tcn(x2, params2)
    assert out2.shape == (B2, 16, L2)
    assert jnp.allclose(out2, ref2, atol=1e-4, rtol=1e-4), "mismatch vs reference (tiled)"

    print("KERNEL_OK")
</pallas_src>

<mosaic_0001>
module attributes {stable_mosaic.version = 11 : i64} {
  func.func @kernel(%arg0: i32, %arg1: i32, %arg2: memref<1x4x16xf32, #tpu.memory_space<vmem>>, %arg3: memref<8x8xf32, #tpu.memory_space<vmem>>, %arg4: memref<8x1xf32, #tpu.memory_space<vmem>>, %arg5: memref<8x16xf32, #tpu.memory_space<vmem>>, %arg6: memref<8x1xf32, #tpu.memory_space<vmem>>, %arg7: memref<8x4xf32, #tpu.memory_space<vmem>>, %arg8: memref<8x1xf32, #tpu.memory_space<vmem>>, %arg9: memref<1x8x16xf32, #tpu.memory_space<vmem>>) attributes {dimension_semantics = [#tpu.dimension_semantics<parallel>, #tpu.dimension_semantics<parallel>], iteration_bounds = array<i64: 2, 1>, scalar_prefetch = 0 : i64, scratch_operands = 0 : i64, tpu.core_type = #tpu.core_type<tc>, window_params = [{transform_indices = @transform_0, window_bounds = array<i64: 1, 4, 16>}, {pipeline_mode = #tpu.pipeline_mode<synchronous>, transform_indices = @transform_1, window_bounds = array<i64: 8, 8>}, {pipeline_mode = #tpu.pipeline_mode<synchronous>, transform_indices = @transform_2, window_bounds = array<i64: 8, 1>}, {pipeline_mode = #tpu.pipeline_mode<synchronous>, transform_indices = @transform_3, window_bounds = array<i64: 8, 16>}, {pipeline_mode = #tpu.pipeline_mode<synchronous>, transform_indices = @transform_4, window_bounds = array<i64: 8, 1>}, {pipeline_mode = #tpu.pipeline_mode<synchronous>, transform_indices = @transform_5, window_bounds = array<i64: 8, 4>}, {pipeline_mode = #tpu.pipeline_mode<synchronous>, transform_indices = @transform_6, window_bounds = array<i64: 8, 1>}, {transform_indices = @transform_7, window_bounds = array<i64: 1, 8, 16>}]} {
    %c0 = arith.constant 0 : index
    %c0_0 = arith.constant 0 : index
    %c0_1 = arith.constant 0 : index
    %0 = vector.load %arg2[%c0, %c0_0, %c0_1] : memref<1x4x16xf32, #tpu.memory_space<vmem>>, vector<1x4x16xf32>
    %1 = vector.shape_cast %0 : vector<1x4x16xf32> to vector<4x16xf32>
    %cst = arith.constant 0.000000e+00 : f32
    %2 = vector.broadcast %cst : f32 to vector<4x2xf32>
    %3 = tpu.concatenate %2, %1 in 1 : vector<4x2xf32>, vector<4x16xf32> -> vector<4x18xf32>
    %4 = vector.extract_strided_slice %3 {offsets = [0, 0], sizes = [4, 17], strides = [1, 1]} : vector<4x18xf32> to vector<4x17xf32>
    %5 = vector.extract_strided_slice %3 {offsets = [0, 1], sizes = [4, 17], strides = [1, 1]} : vector<4x18xf32> to vector<4x17xf32>
    %6 = tpu.concatenate %4, %5 in 0 : vector<4x17xf32>, vector<4x17xf32> -> vector<8x17xf32>
    %c0_2 = arith.constant 0 : index
    %c0_3 = arith.constant 0 : index
    %7 = vector.load %arg3[%c0_2, %c0_3] : memref<8x8xf32, #tpu.memory_space<vmem>>, vector<8x8xf32>
    %cst_4 = arith.constant dense<0.000000e+00> : vector<8x17xf32>
    %8 = tpu.matmul %7, %6, %cst_4 {dimension_numbers = #tpu.dot_dimension_numbers<[1], [0], [0], [1], [0, 0, 1, 1], [], []>} : vector<8x8xf32>, vector<8x17xf32>, vector<8x17xf32> -> vector<8x17xf32>
    %c0_5 = arith.constant 0 : index
    %c0_6 = arith.constant 0 : index
    %9 = vector.load %arg4[%c0_5, %c0_6] : memref<8x1xf32, #tpu.memory_space<vmem>>, vector<8x1xf32>
    %10 = vector.broadcast %9 : vector<8x1xf32> to vector<8x17xf32>
    %11 = arith.addf %8, %10 : vector<8x17xf32>
    %cst_7 = arith.constant 0.000000e+00 : f32
    %12 = vector.broadcast %cst_7 : f32 to vector<8x17xf32>
    %13 = arith.maximumf %11, %12 : vector<8x17xf32>
    %14 = tpu.iota {dimensions = array<i32: 1>} : vector<1x17xi32>
    %c16_i32 = arith.constant 16 : i32
    %15 = arith.muli %arg1, %c16_i32 : i32
    %c1_i32 = arith.constant 1 : i32
    %16 = arith.subi %15, %c1_i32 : i32
    %17 = vector.broadcast %16 : i32 to vector<1x17xi32>
    %18 = arith.addi %17, %14 : vector<1x17xi32>
    %c0_i32 = arith.constant 0 : i32
    %19 = vector.broadcast %c0_i32 : i32 to vector<1x17xi32>
    %20 = arith.cmpi sge, %18, %19 : vector<1x17xi32>
    %cst_8 = arith.constant 0.000000e+00 : f32
    %21 = vector.shape_cast %20 : vector<1x17xi1> to vector<1x17xi1>
    %22 = vector.broadcast %21 : vector<1x17xi1> to vector<8x17xi1>
    %23 = vector.broadcast %cst_8 : f32 to vector<8x17xf32>
    %24 = arith.select %22, %13, %23 : vector<8x17xi1>, vector<8x17xf32>
    %25 = vector.extract_strided_slice %24 {offsets = [0, 0], sizes = [8, 16], strides = [1, 1]} : vector<8x17xf32> to vector<8x16xf32>
    %26 = vector.extract_strided_slice %24 {offsets = [0, 1], sizes = [8, 16], strides = [1, 1]} : vector<8x17xf32> to vector<8x16xf32>
    %27 = tpu.concatenate %25, %26 in 0 : vector<8x16xf32>, vector<8x16xf32> -> vector<16x16xf32>
    %c0_9 = arith.constant 0 : index
    %c0_10 = arith.constant 0 : index
    %28 = vector.load %arg5[%c0_9, %c0_10] : memref<8x16xf32, #tpu.memory_space<vmem>>, vector<8x16xf32>
    %cst_11 = arith.constant dense<0.000000e+00> : vector<8x16xf32>
    %29 = tpu.matmul %28, %27, %cst_11 {dimension_numbers = #tpu.dot_dimension_numbers<[1], [0], [0], [1], [0, 0, 1, 1], [], []>} : vector<8x16xf32>, vector<16x16xf32>, vector<8x16xf32> -> vector<8x16xf32>
    %c0_12 = arith.constant 0 : index
    %c0_13 = arith.constant 0 : index
    %30 = vector.load %arg6[%c0_12, %c0_13] : memref<8x1xf32, #tpu.memory_space<vmem>>, vector<8x1xf32>
    %31 = vector.broadcast %30 : vector<8x1xf32> to vector<8x16xf32>
    %32 = arith.addf %29, %31 : vector<8x16xf32>
    %cst_14 = arith.constant 0.000000e+00 : f32
    %33 = vector.broadcast %cst_14 : f32 to vector<8x16xf32>
    %34 = arith.maximumf %32, %33 : vector<8x16xf32>
    %c0_15 = arith.constant 0 : index
    %c0_16 = arith.constant 0 : index
    %35 = vector.load %arg7[%c0_15, %c0_16] : memref<8x4xf32, #tpu.memory_space<vmem>>, vector<8x4xf32>
    %cst_17 = arith.constant dense<0.000000e+00> : vector<8x16xf32>
    %36 = tpu.matmul %35, %1, %cst_17 {dimension_numbers = #tpu.dot_dimension_numbers<[1], [0], [0], [1], [0, 0, 1, 1], [], []>} : vector<8x4xf32>, vector<4x16xf32>, vector<8x16xf32> -> vector<8x16xf32>
    %c0_18 = arith.constant 0 : index
    %c0_19 = arith.constant 0 : index
    %37 = vector.load %arg8[%c0_18, %c0_19] : memref<8x1xf32, #tpu.memory_space<vmem>>, vector<8x1xf32>
    %38 = vector.broadcast %37 : vector<8x1xf32> to vector<8x16xf32>
    %39 = arith.addf %36, %38 : vector<8x16xf32>
    %40 = arith.addf %34, %39 : vector<8x16xf32>
    %cst_20 = arith.constant 0.000000e+00 : f32
    %41 = vector.broadcast %cst_20 : f32 to vector<8x16xf32>
    %42 = arith.maximumf %40, %41 : vector<8x16xf32>
    %c0_21 = arith.constant 0 : index
    %c0_22 = arith.constant 0 : index
    %c0_23 = arith.constant 0 : index
    %43 = vector.load %arg9[%c0_21, %c0_22, %c0_23] : memref<1x8x16xf32, #tpu.memory_space<vmem>>, vector<1x8x16xf32>
    %44 = vector.shape_cast %43 : vector<1x8x16xf32> to vector<8x16xf32>
    %45 = vector.shape_cast %42 : vector<8x16xf32> to vector<1x8x16xf32>
    tpu.vector_store %arg9[%c0_21, %c0_22, %c0_23], %45 {strides = array<i32>} : memref<1x8x16xf32, #tpu.memory_space<vmem>>, vector<1x8x16xf32>,
    return
  }
  func.func @transform_0(%arg0: i32, %arg1: i32) -> (i32, i32, i32) {
    %c0_i32 = arith.constant 0 : i32
    %c0_i32_0 = arith.constant 0 : i32
    return %arg0, %c0_i32, %arg1 : i32, i32, i32
  }
  func.func @transform_1(%arg0: i32, %arg1: i32) -> (i32, i32) {
    %c0_i32 = arith.constant 0 : i32
    %c0_i32_0 = arith.constant 0 : i32
    %c0_i32_1 = arith.constant 0 : i32
    return %c0_i32, %c0_i32_0 : i32, i32
  }
  func.func @transform_2(%arg0: i32, %arg1: i32) -> (i32, i32) {
    %c0_i32 = arith.constant 0 : i32
    %c0_i32_0 = arith.constant 0 : i32
    %c0_i32_1 = arith.constant 0 : i32
    return %c0_i32, %c0_i32_0 : i32, i32
  }
  func.func @transform_3(%arg0: i32, %arg1: i32) -> (i32, i32) {
    %c0_i32 = arith.constant 0 : i32
    %c0_i32_0 = arith.constant 0 : i32
    %c0_i32_1 = arith.constant 0 : i32
    return %c0_i32, %c0_i32_0 : i32, i32
  }
  func.func @transform_4(%arg0: i32, %arg1: i32) -> (i32, i32) {
    %c0_i32 = arith.constant 0 : i32
    %c0_i32_0 = arith.constant 0 : i32
    %c0_i32_1 = arith.constant 0 : i32
    return %c0_i32, %c0_i32_0 : i32, i32
  }
  func.func @transform_5(%arg0: i32, %arg1: i32) -> (i32, i32) {
    %c0_i32 = arith.constant 0 : i32
    %c0_i32_0 = arith.constant 0 : i32
    %c0_i32_1 = arith.constant 0 : i32
    return %c0_i32, %c0_i32_0 : i32, i32
  }
  func.func @transform_6(%arg0: i32, %arg1: i32) -> (i32, i32) {
    %c0_i32 = arith.constant 0 : i32
    %c0_i32_0 = arith.constant 0 : i32
    %c0_i32_1 = arith.constant 0 : i32
    return %c0_i32, %c0_i32_0 : i32, i32
  }
  func.func @transform_7(%arg0: i32, %arg1: i32) -> (i32, i32, i32) {
    %c0_i32 = arith.constant 0 : i32
    %c0_i32_0 = arith.constant 0 : i32
    return %arg0, %c0_i32, %arg1 : i32, i32, i32
  }
}

</mosaic_0001>

<bundles_post_ra>
// kernel: tpu_custom_call.1
= control target key start
LH: loop header
LB: loop body
LE: loop exit
PB: predicated region body
PF: predicated region fallthrough
CT: control target
= control target key end

     0   :  { %12 = vsyncpa [#allocation3], 0  ;;  %s1011_s0 = inlined_call_operand.vmem [shape: f32[2,4,16], index: 0, kind: input, shape index: {}]   ;;  %s1012_s1 = inlined_call_operand.vmem [shape: f32[8,8], index: 1, kind: input, shape index: {}]   ;;  %s1013_s2 = inlined_call_operand.vmem [shape: f32[8,1], index: 2, kind: input, shape index: {}]   ;;  %s1014_s3 = inlined_call_operand.vmem [shape: f32[8,16], index: 3, kind: input, shape index: {}]   ;;  %s1015_s4 = inlined_call_operand.vmem [shape: f32[8,1], index: 4, kind: input, shape index: {}]   ;;  %s1016_s5 = inlined_call_operand.vmem [shape: f32[8,4], index: 5, kind: input, shape index: {}]   ;;  %s1017_s6 = inlined_call_operand.vmem [shape: f32[8,1], index: 6, kind: input, shape index: {}]   ;;  %s1018_s7 = inlined_call_operand.hbm [shape: f32[2,8,16], index: 7, kind: output, shape index: {}]  }
   0x1   :  { %14 = vsyncpa [#allocation3 + $0x1], 0  ;;  %s889_s24 = smov 0   ;;  %s891_s25 = smov 0  }
   0x2   :  { %s893_s26 = smov 0   ;;  %s895_s27 = smov 0  }
   0x3   :  { %s897_s28 = smov 0   ;;  %s899_s29 = smov 0  }
   0x4 LB: > { %s663_s30 = sadd.s32 4294967295, %s841_s29   ;;  %s664_s8 = sadd.s32 4294967294, %s841_s29   ;;  %s841_s29 = sphi %s899_s29, %s20_s29   ;;  %s837_s28 = sphi %s897_s28, %s1025_s28   ;;  %s833_s27 = sphi %s895_s27, %s1024_s27   ;;  %s829_s26 = sphi %s893_s26, %s1023_s26   ;;  %s825_s25 = sphi %s891_s25, %s1022_s25   ;;  %s821_s24 = sphi %s889_s24, %s1021_s24  }
   0x5   : > { %s32_s9 = sadd.s32 1, %s837_s28  ;;  %s195_s10 = sadd.s32 1, %s829_s26 }
   0x6   : > { %p34_p0 = scmp.ge.s32.totalorder %s32_s9, 2  ;;  %p205_p1 = scmp.ne.s32.totalorder %s829_s26, %s825_s25 }
   0x7   : > { %p206_p2 = scmp.eq.s32.totalorder %s663_s30, 1  ;;  %p211_p3 = scmp.ne.s32.totalorder %s825_s25, %s821_s24 }
   0x8   : > { %s1027_s9 = smov (%p34_p0, %s32_s9), 0  ;;  %p212_p5 = scmp.eq.s32.totalorder %s664_s8, 1 }
   0x9   : > { %p929_p4 = por %p206_p2, %p205_p1  ;;  %s190_s12 = ssub.s32 %s837_s28, %s1027_s9 }
   0xa   : > { %p667_p6 = scmp.ge.s32.totalorder %s841_s29, 1  ;;  %p193_p7 = scmp.eq.s32.totalorder %s190_s12, 0 }
   0xb   : > { %p936_p8 = por %p212_p5, %p211_p3  ;;  %p258_p9 = scmp.lt.s32.totalorder %s841_s29, 3 }
   0xc   : > { %s942_s14 = scalar_select %p193_p7, %s829_s26, %s195_s10  }
   0xd   : > { %p259_p10 = pnand %p667_p6, %p258_p9 }
   0xe   : > { %p292_p11 = scmp.lt.s32.totalorder (!%p259_p10), %s833_s27, 1  ;;  %s843_s20 = smov (!%p259_p10), 2  }
   0xf   : > { %262 = sbr.rel (%p259_p10) target bundleno = 790 (0x316), region = 48  ;;  %s847_s23 = smov (!%p259_p10), 127  }
  0x10   : > { %s289_s21 = sand.u32 (!%p259_p10), 1, %s825_s25   ;;  %s848_s18 = smov (!%p259_p10), [#allocation2]  }
  0x11   : > { %s668_s22 = sshll.u32 (!%p259_p10), %s289_s21, 3 }
  0x12   : > { %s291_s30 = scalar_lea.vmem (!%p259_p10), [#allocation2], %s668_s22 }
  0x13   : > { %s592_s8 = sshll.u32 (!%p259_p10), %s291_s30, 4  ;;  %s593_s8 = int_to_ptr.vmem [resolvable:$true] %s592_s8 }
  0x14   : > { %s293_s15 = scalar_select %p292_p11, %s833_s27, 1  ;;  %v844_v1 = vmov 0.0   ;;  %vm845_vm0 = vmmov 0   ;;  %v314_v2 = vld [vmem:[%s1013_s2] sm:$0xff]  ;;  %v846_v3 = vmov 0   ;;  %vm304_vm1 = vcmask 15360  }
  0x15   : > { %686 = vmatprep.subr.mxu0 %v844_v1  ;;  %691 = vmatprep.subr.mxu1 %v844_v1  ;;  %vm311_vm2 = vcmask 1043456   ;;  %v313_v8 = vld [vmem:[%s1012_s1] sm:$0xff]  ;;  %vm320_vm3 = vcmask 64512   ;;  %vm498_vm4 = vcmask 31744   ;;  %v395_v11 = vlaneseq  ;;  %s765_s17 = scalar_lea.vmem %s593_s8, 128 }
  0x16   : > { %s669_s16 = sshll.u32 %s293_s15, 2  ;;  %688 = vmatprep.mubr.msk.f32.mxu0 %vm845_vm0, %v844_v1  ;;  %695 = vmatprep.mubr.msk.f32.mxu1 %vm845_vm0, %v844_v1  ;;  %v491_v10 = vld [vmem:[%s1016_s5] sm:$0xff]  ;;  %vm416_vm6 = vcmask 130048   ;;  %p766_p12 = scmp.ne.s32.totalorder %s593_s8, %s765_s17 }
  0x17   : > { %s298_s19 = scalar_lea.vmem %s1011_s0, %s669_s16  ;;  %763 = vset.pattern.permute.xlu1 %v846_v3  ;;  %764 = vset.pattern.permute.xlu0 %v846_v3  ;;  %v396_v12 = vand.u32 127, %v395_v11  ;;  %v410_v21 = vld [vmem:[%s1015_s4] sm:$0xff]  ;;  %s578_s16 = scalar_lea.sflag [#allocation3], %s289_s21 }
  0x18   : > { %v299_v0 = vld [vmem:[%s298_s19] sm:$0xf]  ;;  %317 = vperm.xlu1 %763, %v314_v2   ;;  %p767_p13 = pnand %p766_p12, %p929_p4  ;;  %s769_s19 = sshll.u32 %s848_s18, 4  ;;  %s770_s19 = int_to_ptr.vmem [resolvable:$false] %s769_s19 }
  0x19   : > { %301 = vrot.lane.b32.xlu0 %v299_v0, %s843_s20  ;;  %v400_v14 = vadd.s32 4294967295, %v396_v12  ;;  %v492_v22 = vld [vmem:[%s1017_s6] sm:$0xff]  ;;  %p772_p1 = scmp.lt.s32.totalorder %s593_s8, %s770_s19 }
  0x1a   : > { %v409_v25 = vld [vmem:[%s1014_s3] sm:$0xff]  ;;  %p768_p0 = pneg %p767_p13 }
  0x1b   : > { %vm401_vm5 = vcmp.ge.s32.totalorder %v400_v14, 0 }
  0x8b   : > { %v302_v4 = vpop.permute.xlu0 %301 }
  0x8c   : > { %v305_v5 = vsel %vm304_vm1, 0.0, %v302_v4 }
  0x8d   : > { %v307_v6 = vrot.slane %v305_v5, 4 }
  0x8f   : > { %308 = vrot.lane.b32.xlu0 %v307_v6, %s847_s23 }
  0x93   : > { %v318_v13 = vpop.permute.xlu1 %317  ;;  %413 = vperm.xlu0 %764, %v410_v21  }
 0x101   : > { %v309_v7 = vpop.permute.xlu0 %308 }
 0x102   : > { %v312_v9 = vsel %vm311_vm2, %v305_v5, %v309_v7 }
 0x103   : > { %687 = vmatpush3.msra.mxu0 %v312_v9 }
 0x104   : > { %689 = vmatmul.mubr.msk.f32.vlgmr.msra.gmra.mxu0 %vm320_vm3, %v313_v8  ;;  %698 = vmatprep.subr.mxu0 %v844_v1 }
 0x105   : > { %699 = vmatpush3.msk.msra.mxu0 %vm311_vm2, %v299_v0  ;;  %700 = vmatprep.mubr.msk.f32.mxu0 %vm845_vm0, %v844_v1 }
 0x108   : > { %701 = vmatmul.mubr.msk.f32.vlgmr.msra.gmra.mxu0 %vm498_vm4, %v491_v10 }
 0x10e   : > { %v414_v26 = vpop.permute.xlu0 %413 }
 0x1c4   : > { %v390_v15 = vpop.f32.mrf.mxu0 }
 0x1c5   : > { %v391_v16 = vadd.f32 %v390_v15, %v318_v13 }
 0x1c6   : > { %v690_v17 = vpop.f32.mrf.mxu0 }
 0x1c7   : > { %v394_v18 = vmax.f32 %v391_v16, 0.0 }
 0x1c8   : > { %v570_v20 = vpop.f32.mrf.mxu0 }
 0x1c9   : > { %v404_v19 = vsel %vm401_vm5, %v394_v18, 0.0 }
 0x1ca   : > { %406 = vrot.lane.b32.xlu1 %v404_v19, %s847_s23  ;;  %v702_v23 = vpop.f32.mrf.mxu0  ;;  %s676_s23 = sshll.u32 %s833_s27, 7  ;;  %s771_s27 = scalar_lea.vmem %s770_s19, 256 }
 0x1cb   : > { %s590_s15 = scalar_lea.hbm %s1018_s7, %s676_s23  ;;  %p773_p2 = scmp.lt.s32.totalorder %s771_s27, %s765_s17 }
 0x1cd   : > { %p774_p3 = por %p773_p2, %p772_p1 }
 0x1ce   : > { %495 = vperm.xlu1 %763, %v492_v22  }
 0x1cf   : > { %p775_p5 = pnand %p774_p3, %p768_p0 }
 0x23c   : > { %v407_v24 = vpop.permute.xlu1 %406 }
 0x23d   : > { %692 = vmatpush3.msra.mxu1 %v407_v24 }
 0x23e   : > { %693 = vmatprep.subr.mxu1 %v844_v1 }
 0x23f   : > { %694 = vmatpush3.msk.msra.mxu1 %vm401_vm5, %v394_v18 }
 0x240   : > { %696 = vmatmul.mubr.msk.f32.vlgmr.msra.gmra.mxu1 %vm416_vm6, %v409_v25 }
 0x249   : > { %v496_v27 = vpop.permute.xlu1 %495 }
 0x24a   : > { %v571_v31 = vadd.f32 %v570_v20, %v496_v27 }
 0x300   : > { %v486_v28 = vpop.f32.mrf.mxu1 }
 0x301   : > { %v487_v29 = vadd.f32 %v486_v28, %v414_v26 }
 0x302   : > { %v697_v30 = vpop.f32.mrf.mxu1 }
 0x303   : > { %v490_v32 = vmax.f32 %v487_v29, 0.0 }
 0x305   : > { %v574_v33 = vadd.f32 %v571_v31, %v490_v32 }
 0x307   : > { %v575_v34 = vmax.f32 %v574_v33, 0.0 }
 0x309   : > { %576 = vst.msk [vmem:[%s291_s30] sm:$0xff] %vm416_vm6, %v575_v34 }
 0x30a   : > { %778 = shalt.err (!%p775_p5)
}
 0x30b   : > { %s779_s20 = scalar_lea.hbm %s590_s15, 128  ;;  %s783_s23 = scalar_lea.hbm %s1018_s7, 256 }
 0x30c   : > { %p780_p6 = scmp.ne.s32.totalorder %s590_s15, %s779_s20  ;;  %p784_p10 = scmp.lt.s32.totalorder %s590_s15, %s1018_s7 }
 0x30d   : > { %p785_p11 = scmp.lt.s32.totalorder %s783_s23, %s779_s20 }
 0x30e   : > { %p781_p7 = pnand %p780_p6, %p929_p4 }
 0x30f   : > { %p786_p12 = por %p785_p11, %p784_p10 }
 0x310   : > { %p782_p9 = pneg %p781_p7 }
 0x312   : > { %p787_p13 = pnand %p786_p12, %p782_p9 }
 0x314   : > { %790 = shalt.err (!%p787_p13)
}
 0x315   : > { %703 = dma.vmem_to_hbm [thread:$0]  (%p929_p4), %s593_s8, 128, %s590_s15, %s578_s16  }
 0x316 PF: > { %p709_p0 = scmp.ge.s32.totalorder %s841_s29, 2  ;;  %s604_s12 = sand.u32 1, %s821_s24  }
 0x317   : > { %s605_s17 = scalar_lea.sflag [#allocation3], %s604_s12 }
 0x318   : > { %p706_p1 = pnand %p709_p0, %p936_p8 }
 0x31a   : > { %p707_p2 = pneg %p706_p1 }
 0x31c   : > { %816 = dma.done.wait (%p707_p2), %s605_s17, 128  }
 0x31d   : > { %818 = vsyncadd (%p707_p2), %s605_s17, 4294967168  ;;  %s20_s29 = sadd.s32 1, %s841_s29   ;;  %s1021_s24 = smov %s825_s25 }
 0x31e   : > { %p17_p3 = scmp.ge.s32.totalorder %s20_s29, 4   ;;  %s1022_s25 = smov %s829_s26 }
 0x31f   : > { %s1023_s26 = smov %s942_s14  ;;  %s1024_s27 = smov %s837_s28 }
 0x320   : > { %s1025_s28 = smov %s1027_s9  ;;  %19 = sbr.rel (!%p17_p3) target bundleno = 4 (0x4), region = 83 }
 0x325   :  { %610 = vsyncpa [#allocation3], 1 }
 0x326   :  { %612 = vsyncpa [#allocation3 + $0x1], 1 }

</bundles_post_ra>
